<compile_context>
chip_gen: v7x
topology: tpu7x:2x2x1
jax: 0.10.0
libtpu: 0.0.40
codegen_flags: <defaults>
</compile_context>

<pallas_src>
import jax
import jax.numpy as jnp
from jax.experimental import pallas as pl
from jax.experimental.pallas import tpu as pltpu

# ---- loss configuration (see header) -------------------------------------------
DICE_SMOOTH = 1e-5
SREC_SMOOTH = 1e-5
BATCH_DICE = False          # ddp=False, so the AllGatherGrad branch never triggers
WEIGHT_CE = 1.0
WEIGHT_DICE = 1.0
WEIGHT_SREC = 1.0

_TILE_BYTES_BUDGET = 4 << 20   # per-input working-set budget (before double-buffering)
_MAX_TILE_ROWS = 512           # hard cap on sublane rows per spatial tile


def _choose_tile_rows(S, C, logits_itemsize, label_itemsize):
    """Largest divisor of S that is sublane-legal (mult of 8 or == S) and whose
    (1, C, TS, 128) logits block + two (1, 1, TS, 128) label blocks fit the budget."""
    per_row = 128 * (C * logits_itemsize + 2 * label_itemsize)
    max_rows = max(1, min(_MAX_TILE_ROWS, _TILE_BYTES_BUDGET // max(per_row, 1)))
    best = None
    for t in range(1, min(S, max_rows) + 1):
        if S % t == 0 and (t % 8 == 0 or t == S):
            best = t
    return best if best is not None else S


def _stats_kernel(logits_ref, target_ref, skel_ref, out_ref, acc_ref):
    """Accumulate per-(batch, fg-class) loss statistics over spatial tiles.

    Block shapes:
      logits_ref : (1, C, TS, 128)   bf16 / f32 raw logits
      target_ref : (1, 1, TS, 128)   integer segmentation labels
      skel_ref   : (1, 1, TS, 128)   integer skeleton labels
      out_ref    : (1, NROWS, 128)   f32 packed per-lane partial sums (written once)
      acc_ref    : (NROWS, 128)      f32 VMEM scratch accumulator

    Row layout (nfg = C-1):
      [0 .. nfg)       dice intersect          [3nfg .. 4nfg)  skel-recall intersect
      [nfg .. 2nfg)    dice sum_pred           [4nfg .. 5nfg)  skel-recall sum_gt
      [2nfg .. 3nfg)   dice sum_gt             5nfg            summed cross entropy
    """
    p = pl.program_id(1)

    @pl.when(p == 0)
    def _():
        acc_ref[...] = jnp.zeros_like(acc_ref)

    C = logits_ref.shape[1]
    nfg = C - 1

    # Per-class logit planes as full-vreg (TS,128) tiles; widen only after the load.
    rows = [logits_ref[0, c].astype(jnp.float32) for c in range(C)]
    target = target_ref[0, 0].astype(jnp.int32)
    skel = skel_ref[0, 0].astype(jnp.int32)

    # Channel softmax with the (tiny) class axis unrolled: pure VALU/EUP work.
    m = rows[0]
    for c in range(1, C):
        m = jnp.maximum(m, rows[c])
    exps = [jnp.exp(r - m) for r in rows]
    denom = exps[0]
    for c in range(1, C):
        denom = denom + exps[c]
    inv = pl.reciprocal(denom, approx=True)      # EUP slot; exact fallback: 1.0/denom
    lse = m + jnp.log(denom)                      # log-sum-exp for the CE term

    # CE numerator: logit at the target class via chained selects (no one-hot tensor).
    logit_t = jnp.where(target == 0, rows[0], 0.0)
    for c in range(1, C):
        logit_t = jnp.where(target == c, rows[c], logit_t)

    def lane_partial(x):                          # (TS,128) -> (1,128) per-lane sums
        return jnp.sum(x, axis=0, keepdims=True)

    for c in range(1, C):                         # foreground classes only
        i = c - 1
        prob_c = exps[c] * inv
        t_m = target == c
        s_m = skel == c
        acc_ref[i:i + 1, :] += lane_partial(jnp.where(t_m, prob_c, 0.0))
        acc_ref[nfg + i:nfg + i + 1, :] += lane_partial(prob_c)
        acc_ref[2 * nfg + i:2 * nfg + i + 1, :] += lane_partial(t_m.astype(jnp.float32))
        acc_ref[3 * nfg + i:3 * nfg + i + 1, :] += lane_partial(jnp.where(s_m, prob_c, 0.0))
        acc_ref[4 * nfg + i:4 * nfg + i + 1, :] += lane_partial(s_m.astype(jnp.float32))

    ce_row = 5 * nfg
    acc_ref[ce_row:ce_row + 1, :] += lane_partial(lse - logit_t)

    @pl.when(p == pl.num_programs(1) - 1)
    def _():
        out_ref[0] = acc_ref[...]                 # single lane-dense writeback per item


def _run_stats_kernel(logits, target, skel):
    B, C, S, L = logits.shape                     # L == 128
    nfg = C - 1
    n_rows = 5 * nfg + 1
    n_rows_pad = ((n_rows + 7) // 8) * 8

    TS = _choose_tile_rows(S, C,
                           jnp.dtype(logits.dtype).itemsize,
                           jnp.dtype(target.dtype).itemsize)
    n_pb = S // TS

    npix = B * S * L
    bytes_accessed = (logits.size * jnp.dtype(logits.dtype).itemsize
                      + target.size * jnp.dtype(target.dtype).itemsize
                      + skel.size * jnp.dtype(skel.dtype).itemsize
                      + B * n_rows_pad * 128 * 4)
    cost = pl.CostEstimate(
        flops=int(12 * C * npix),
        transcendentals=int((C + 2) * npix),
        bytes_accessed=int(bytes_accessed),
    )

    return pl.pallas_call(
        _stats_kernel,
        out_shape=jax.ShapeDtypeStruct((B, n_rows_pad, 128), jnp.float32),
        grid_spec=pltpu.PrefetchScalarGridSpec(
            num_scalar_prefetch=0,
            grid=(B, n_pb),
            in_specs=[
                pl.BlockSpec((1, C, TS, L), lambda b, p: (b, 0, p, 0)),
                pl.BlockSpec((1, 1, TS, L), lambda b, p: (b, 0, p, 0)),
                pl.BlockSpec((1, 1, TS, L), lambda b, p: (b, 0, p, 0)),
            ],
            out_specs=pl.BlockSpec((1, n_rows_pad, 128), lambda b, p: (b, 0, 0)),
            scratch_shapes=[pltpu.VMEM((n_rows_pad, 128), jnp.float32)],
        ),
        compiler_params=pltpu.CompilerParams(
            dimension_semantics=("parallel", "arbitrary")),
        cost_estimate=cost,
    )(logits, target, skel)


def dc_skelrec_ce_loss(net_output, target, skel,
                       weight_ce=WEIGHT_CE, weight_dice=WEIGHT_DICE, weight_srec=WEIGHT_SREC):
    """Equivalent of DC_SkelREC_and_CE_loss.forward (ignore_label=None)."""
    B, C = net_output.shape[0], net_output.shape[1]
    P = 1
    for d in net_output.shape[2:]:
        P *= d
    if P % 128 != 0:
        # TODO(synk): pad + per-pixel validity masking for spatial sizes not a multiple of 128.
        raise ValueError("flattened spatial size must be a multiple of 128")
    S = P // 128

    # NOTE: no dtype up-casts here — bf16 logits / narrow int labels stream from HBM
    # unchanged and are widened to f32 / i32 inside the kernel after the VMEM load.
    logits = net_output.reshape(B, C, S, 128)
    t = target.reshape(B, 1, S, 128)
    s = skel.reshape(B, 1, S, 128)

    raw = _run_stats_kernel(logits, t, s)         # (B, NROWS_pad, 128) f32
    stats = raw.sum(-1)                            # tiny final lane reduction in plain JAX
    nfg = C - 1
    d_inter = stats[:, 0:nfg]
    d_spred = stats[:, nfg:2 * nfg]
    d_sgt = stats[:, 2 * nfg:3 * nfg]
    s_inter = stats[:, 3 * nfg:4 * nfg]
    s_sgt = stats[:, 4 * nfg:5 * nfg]
    ce_sum = stats[:, 5 * nfg]

    if BATCH_DICE:
        d_inter = d_inter.sum(0)
        d_spred = d_spred.sum(0)
        d_sgt = d_sgt.sum(0)
        s_inter = s_inter.sum(0)
        s_sgt = s_sgt.sum(0)

    # MemoryEfficientSoftDiceLoss: returns -mean(dc)
    dc = (2.0 * d_inter + DICE_SMOOTH) / jnp.clip(d_sgt + d_spred + DICE_SMOOTH, 1e-8)
    dc_loss = -jnp.mean(dc)

    # SoftSkeletonRecallLoss: returns 1 - mean(rec)
    rec = (s_inter + SREC_SMOOTH) / jnp.clip(s_sgt + SREC_SMOOTH, 1e-8)
    srec_loss = 1.0 - jnp.mean(rec)

    # RobustCrossEntropyLoss (mean over all pixels)
    ce_loss = jnp.sum(ce_sum) / (B * P)

    return weight_ce * ce_loss + weight_dice * dc_loss + weight_srec * srec_loss


def reference_loss(net_output, target, skel):
    """Pure-JAX transcription of the PyTorch forward, for verification."""
    B, C, H, W = net_output.shape
    x = net_output.astype(jnp.float32)
    probs = jax.nn.softmax(x, axis=1)
    t = target[:, 0].astype(jnp.int32)
    s = skel[:, 0].astype(jnp.int32)
    t_oh = jax.nn.one_hot(t, C, axis=1, dtype=jnp.float32)
    s_oh = jax.nn.one_hot(s, C, axis=1, dtype=jnp.float32)
    axes = (2, 3)
    x_fg = probs[:, 1:]
    inter = jnp.sum(x_fg * t_oh[:, 1:], axes)
    spred = jnp.sum(x_fg, axes)
    sgt = jnp.sum(t_oh[:, 1:], axes)
    dc = (2 * inter + DICE_SMOOTH) / jnp.clip(sgt + spred + DICE_SMOOTH, 1e-8)
    dc_loss = -jnp.mean(dc)
    s_inter = jnp.sum(x_fg * s_oh[:, 1:], axes)
    s_sgt = jnp.sum(s_oh[:, 1:], axes)
    rec = (s_inter + SREC_SMOOTH) / jnp.clip(s_sgt + SREC_SMOOTH, 1e-8)
    srec_loss = 1.0 - jnp.mean(rec)
    logp = jax.nn.log_softmax(x, axis=1)
    ce_loss = -jnp.mean(jnp.take_along_axis(logp, t[:, None], axis=1))
    return WEIGHT_CE * ce_loss + WEIGHT_DICE * dc_loss + WEIGHT_SREC * srec_loss


if __name__ == "__main__":
    key = jax.random.PRNGKey(0)
    k1, k2, k3 = jax.random.split(key, 3)
    B, C, H, W = 2, 4, 16, 16     # H*W = 256 (multiple of 128 for the lane axis)
    # bf16 logits + integer labels go straight to the kernel (no wrapper up-cast).
    net_output = jax.random.normal(k1, (B, C, H, W), dtype=jnp.bfloat16)
    target = jax.random.randint(k2, (B, 1, H, W), 0, C, dtype=jnp.int32)
    skel = jax.random.randint(k3, (B, 1, H, W), 0, C, dtype=jnp.int32)

    loss = dc_skelrec_ce_loss(net_output, target, skel)
    loss = jax.block_until_ready(loss)

    ref = reference_loss(net_output, target, skel)
    # slightly looser tolerance: approx EUP reciprocal in the softmax (loss-level error)
    assert jnp.allclose(loss, ref, rtol=2e-3, atol=2e-3), (float(loss), float(ref))
    print("KERNEL_OK")
</pallas_src>

<mosaic_0001>
module attributes {stable_mosaic.version = 11 : i64} {
  func.func @_stats_kernel(%arg0: i32, %arg1: i32, %arg2: memref<1x4x2x128xbf16, #tpu.memory_space<vmem>>, %arg3: memref<1x1x2x128xi32, #tpu.memory_space<vmem>>, %arg4: memref<1x1x2x128xi32, #tpu.memory_space<vmem>>, %arg5: memref<1x16x128xf32, #tpu.memory_space<vmem>>, %arg6: memref<16x128xf32, #tpu.memory_space<vmem>>) attributes {dimension_semantics = [#tpu.dimension_semantics<parallel>, #tpu.dimension_semantics<arbitrary>], iteration_bounds = array<i64: 2, 1>, scalar_prefetch = 0 : i64, scratch_operands = 1 : i64, tpu.core_type = #tpu.core_type<tc>, window_params = [{transform_indices = @transform_0, window_bounds = array<i64: 1, 4, 2, 128>}, {transform_indices = @transform_1, window_bounds = array<i64: 1, 1, 2, 128>}, {transform_indices = @transform_2, window_bounds = array<i64: 1, 1, 2, 128>}, {transform_indices = @transform_3, window_bounds = array<i64: 1, 16, 128>}]} {
    %c0_i32 = arith.constant 0 : i32
    %0 = arith.cmpi eq, %arg1, %c0_i32 : i32
    %1 = arith.extui %0 : i1 to i32
    %c0_i32_0 = arith.constant 0 : i32
    %2 = arith.cmpi ne, %1, %c0_i32_0 : i32
    scf.if %2 {
      %cst_104 = arith.constant 0.000000e+00 : f32
      %172 = vector.broadcast %cst_104 : f32 to vector<16x128xf32>
      %c0_105 = arith.constant 0 : index
      %c0_106 = arith.constant 0 : index
      %173 = vector.load %arg6[%c0_105, %c0_106] : memref<16x128xf32, #tpu.memory_space<vmem>>, vector<16x128xf32>
      tpu.vector_store %arg6[%c0_105, %c0_106], %172 {strides = array<i32>} : memref<16x128xf32, #tpu.memory_space<vmem>>, vector<16x128xf32>,
    } else {
    }
    %c0 = arith.constant 0 : index
    %c0_1 = arith.constant 0 : index
    %c0_2 = arith.constant 0 : index
    %c0_3 = arith.constant 0 : index
    %3 = vector.load %arg2[%c0, %c0_1, %c0_2, %c0_3] : memref<1x4x2x128xbf16, #tpu.memory_space<vmem>>, vector<1x1x2x128xbf16>
    %4 = vector.shape_cast %3 : vector<1x1x2x128xbf16> to vector<2x128xbf16>
    %5 = arith.extf %4 : vector<2x128xbf16> to vector<2x128xf32>
    %c0_4 = arith.constant 0 : index
    %c1 = arith.constant 1 : index
    %c0_5 = arith.constant 0 : index
    %c0_6 = arith.constant 0 : index
    %6 = vector.load %arg2[%c0_4, %c1, %c0_5, %c0_6] : memref<1x4x2x128xbf16, #tpu.memory_space<vmem>>, vector<1x1x2x128xbf16>
    %7 = vector.shape_cast %6 : vector<1x1x2x128xbf16> to vector<2x128xbf16>
    %8 = arith.extf %7 : vector<2x128xbf16> to vector<2x128xf32>
    %c0_7 = arith.constant 0 : index
    %c2 = arith.constant 2 : index
    %c0_8 = arith.constant 0 : index
    %c0_9 = arith.constant 0 : index
    %9 = vector.load %arg2[%c0_7, %c2, %c0_8, %c0_9] : memref<1x4x2x128xbf16, #tpu.memory_space<vmem>>, vector<1x1x2x128xbf16>
    %10 = vector.shape_cast %9 : vector<1x1x2x128xbf16> to vector<2x128xbf16>
    %11 = arith.extf %10 : vector<2x128xbf16> to vector<2x128xf32>
    %c0_10 = arith.constant 0 : index
    %c3 = arith.constant 3 : index
    %c0_11 = arith.constant 0 : index
    %c0_12 = arith.constant 0 : index
    %12 = vector.load %arg2[%c0_10, %c3, %c0_11, %c0_12] : memref<1x4x2x128xbf16, #tpu.memory_space<vmem>>, vector<1x1x2x128xbf16>
    %13 = vector.shape_cast %12 : vector<1x1x2x128xbf16> to vector<2x128xbf16>
    %14 = arith.extf %13 : vector<2x128xbf16> to vector<2x128xf32>
    %c0_13 = arith.constant 0 : index
    %c0_14 = arith.constant 0 : index
    %c0_15 = arith.constant 0 : index
    %c0_16 = arith.constant 0 : index
    %15 = vector.load %arg3[%c0_13, %c0_14, %c0_15, %c0_16] : memref<1x1x2x128xi32, #tpu.memory_space<vmem>>, vector<1x1x2x128xi32>
    %16 = vector.shape_cast %15 : vector<1x1x2x128xi32> to vector<2x128xi32>
    %c0_17 = arith.constant 0 : index
    %c0_18 = arith.constant 0 : index
    %c0_19 = arith.constant 0 : index
    %c0_20 = arith.constant 0 : index
    %17 = vector.load %arg4[%c0_17, %c0_18, %c0_19, %c0_20] : memref<1x1x2x128xi32, #tpu.memory_space<vmem>>, vector<1x1x2x128xi32>
    %18 = vector.shape_cast %17 : vector<1x1x2x128xi32> to vector<2x128xi32>
    %19 = arith.maximumf %5, %8 : vector<2x128xf32>
    %20 = arith.maximumf %19, %11 : vector<2x128xf32>
    %21 = arith.maximumf %20, %14 : vector<2x128xf32>
    %22 = arith.subf %5, %21 : vector<2x128xf32>
    %23 = math.exp %22 : vector<2x128xf32>
    %24 = arith.subf %8, %21 : vector<2x128xf32>
    %25 = math.exp %24 : vector<2x128xf32>
    %26 = arith.subf %11, %21 : vector<2x128xf32>
    %27 = math.exp %26 : vector<2x128xf32>
    %28 = arith.subf %14, %21 : vector<2x128xf32>
    %29 = math.exp %28 : vector<2x128xf32>
    %30 = arith.addf %23, %25 : vector<2x128xf32>
    %31 = arith.addf %30, %27 : vector<2x128xf32>
    %32 = arith.addf %31, %29 : vector<2x128xf32>
    %33 = tpu.reciprocal %32 {approx = true} : vector<2x128xf32> -> vector<2x128xf32>
    %34 = math.log %32 : vector<2x128xf32>
    %35 = arith.addf %21, %34 : vector<2x128xf32>
    %c0_i32_21 = arith.constant 0 : i32
    %36 = vector.broadcast %c0_i32_21 : i32 to vector<2x128xi32>
    %37 = arith.cmpi eq, %16, %36 : vector<2x128xi32>
    %cst = arith.constant 0.000000e+00 : f32
    %38 = vector.broadcast %cst : f32 to vector<2x128xf32>
    %39 = arith.select %37, %5, %38 : vector<2x128xi1>, vector<2x128xf32>
    %c1_i32 = arith.constant 1 : i32
    %40 = vector.broadcast %c1_i32 : i32 to vector<2x128xi32>
    %41 = arith.cmpi eq, %16, %40 : vector<2x128xi32>
    %42 = arith.select %41, %8, %39 : vector<2x128xi1>, vector<2x128xf32>
    %c2_i32 = arith.constant 2 : i32
    %43 = vector.broadcast %c2_i32 : i32 to vector<2x128xi32>
    %44 = arith.cmpi eq, %16, %43 : vector<2x128xi32>
    %45 = arith.select %44, %11, %42 : vector<2x128xi1>, vector<2x128xf32>
    %c3_i32 = arith.constant 3 : i32
    %46 = vector.broadcast %c3_i32 : i32 to vector<2x128xi32>
    %47 = arith.cmpi eq, %16, %46 : vector<2x128xi32>
    %48 = arith.select %47, %14, %45 : vector<2x128xi1>, vector<2x128xf32>
    %49 = arith.mulf %25, %33 : vector<2x128xf32>
    %c1_i32_22 = arith.constant 1 : i32
    %50 = vector.broadcast %c1_i32_22 : i32 to vector<2x128xi32>
    %51 = arith.cmpi eq, %16, %50 : vector<2x128xi32>
    %c1_i32_23 = arith.constant 1 : i32
    %52 = vector.broadcast %c1_i32_23 : i32 to vector<2x128xi32>
    %53 = arith.cmpi eq, %18, %52 : vector<2x128xi32>
    %c0_24 = arith.constant 0 : index
    %c0_25 = arith.constant 0 : index
    %54 = vector.load %arg6[%c0_24, %c0_25] : memref<16x128xf32, #tpu.memory_space<vmem>>, vector<1x128xf32>
    %cst_26 = arith.constant 0.000000e+00 : f32
    %55 = vector.broadcast %cst_26 : f32 to vector<2x128xf32>
    %56 = arith.select %51, %49, %55 : vector<2x128xi1>, vector<2x128xf32>
    %cst_27 = arith.constant dense<0.000000e+00> : vector<128xf32>
    %57 = vector.multi_reduction <add>, %56, %cst_27 [0] : vector<2x128xf32> to vector<128xf32>
    %58 = vector.shape_cast %57 : vector<128xf32> to vector<1x128xf32>
    %59 = arith.addf %54, %58 : vector<1x128xf32>
    %c0_28 = arith.constant 0 : index
    %c0_29 = arith.constant 0 : index
    %60 = vector.load %arg6[%c0_28, %c0_29] : memref<16x128xf32, #tpu.memory_space<vmem>>, vector<1x128xf32>
    tpu.vector_store %arg6[%c0_28, %c0_29], %59 {strides = array<i32>} : memref<16x128xf32, #tpu.memory_space<vmem>>, vector<1x128xf32>,
    %c3_30 = arith.constant 3 : index
    %c0_31 = arith.constant 0 : index
    %61 = vector.load %arg6[%c3_30, %c0_31] : memref<16x128xf32, #tpu.memory_space<vmem>>, vector<1x128xf32>
    %cst_32 = arith.constant dense<0.000000e+00> : vector<128xf32>
    %62 = vector.multi_reduction <add>, %49, %cst_32 [0] : vector<2x128xf32> to vector<128xf32>
    %63 = vector.shape_cast %62 : vector<128xf32> to vector<1x128xf32>
    %64 = arith.addf %61, %63 : vector<1x128xf32>
    %c3_33 = arith.constant 3 : index
    %c0_34 = arith.constant 0 : index
    %65 = vector.load %arg6[%c3_33, %c0_34] : memref<16x128xf32, #tpu.memory_space<vmem>>, vector<1x128xf32>
    tpu.vector_store %arg6[%c3_33, %c0_34], %64 {strides = array<i32>} : memref<16x128xf32, #tpu.memory_space<vmem>>, vector<1x128xf32>,
    %c6 = arith.constant 6 : index
    %c0_35 = arith.constant 0 : index
    %66 = vector.load %arg6[%c6, %c0_35] : memref<16x128xf32, #tpu.memory_space<vmem>>, vector<1x128xf32>
    %67 = arith.extui %51 : vector<2x128xi1> to vector<2x128xi32>
    %68 = arith.sitofp %67 : vector<2x128xi32> to vector<2x128xf32>
    %cst_36 = arith.constant dense<0.000000e+00> : vector<128xf32>
    %69 = vector.multi_reduction <add>, %68, %cst_36 [0] : vector<2x128xf32> to vector<128xf32>
    %70 = vector.shape_cast %69 : vector<128xf32> to vector<1x128xf32>
    %71 = arith.addf %66, %70 : vector<1x128xf32>
    %c6_37 = arith.constant 6 : index
    %c0_38 = arith.constant 0 : index
    %72 = vector.load %arg6[%c6_37, %c0_38] : memref<16x128xf32, #tpu.memory_space<vmem>>, vector<1x128xf32>
    tpu.vector_store %arg6[%c6_37, %c0_38], %71 {strides = array<i32>} : memref<16x128xf32, #tpu.memory_space<vmem>>, vector<1x128xf32>,
    %c9 = arith.constant 9 : index
    %c0_39 = arith.constant 0 : index
    %73 = vector.load %arg6[%c9, %c0_39] : memref<16x128xf32, #tpu.memory_space<vmem>>, vector<1x128xf32>
    %cst_40 = arith.constant 0.000000e+00 : f32
    %74 = vector.broadcast %cst_40 : f32 to vector<2x128xf32>
    %75 = arith.select %53, %49, %74 : vector<2x128xi1>, vector<2x128xf32>
    %cst_41 = arith.constant dense<0.000000e+00> : vector<128xf32>
    %76 = vector.multi_reduction <add>, %75, %cst_41 [0] : vector<2x128xf32> to vector<128xf32>
    %77 = vector.shape_cast %76 : vector<128xf32> to vector<1x128xf32>
    %78 = arith.addf %73, %77 : vector<1x128xf32>
    %c9_42 = arith.constant 9 : index
    %c0_43 = arith.constant 0 : index
    %79 = vector.load %arg6[%c9_42, %c0_43] : memref<16x128xf32, #tpu.memory_space<vmem>>, vector<1x128xf32>
    tpu.vector_store %arg6[%c9_42, %c0_43], %78 {strides = array<i32>} : memref<16x128xf32, #tpu.memory_space<vmem>>, vector<1x128xf32>,
    %c12 = arith.constant 12 : index
    %c0_44 = arith.constant 0 : index
    %80 = vector.load %arg6[%c12, %c0_44] : memref<16x128xf32, #tpu.memory_space<vmem>>, vector<1x128xf32>
    %81 = arith.extui %53 : vector<2x128xi1> to vector<2x128xi32>
    %82 = arith.sitofp %81 : vector<2x128xi32> to vector<2x128xf32>
    %cst_45 = arith.constant dense<0.000000e+00> : vector<128xf32>
    %83 = vector.multi_reduction <add>, %82, %cst_45 [0] : vector<2x128xf32> to vector<128xf32>
    %84 = vector.shape_cast %83 : vector<128xf32> to vector<1x128xf32>
    %85 = arith.addf %80, %84 : vector<1x128xf32>
    %c12_46 = arith.constant 12 : index
    %c0_47 = arith.constant 0 : index
    %86 = vector.load %arg6[%c12_46, %c0_47] : memref<16x128xf32, #tpu.memory_space<vmem>>, vector<1x128xf32>
    tpu.vector_store %arg6[%c12_46, %c0_47], %85 {strides = array<i32>} : memref<16x128xf32, #tpu.memory_space<vmem>>, vector<1x128xf32>,
    %87 = arith.mulf %27, %33 : vector<2x128xf32>
    %c2_i32_48 = arith.constant 2 : i32
    %88 = vector.broadcast %c2_i32_48 : i32 to vector<2x128xi32>
    %89 = arith.cmpi eq, %16, %88 : vector<2x128xi32>
    %c2_i32_49 = arith.constant 2 : i32
    %90 = vector.broadcast %c2_i32_49 : i32 to vector<2x128xi32>
    %91 = arith.cmpi eq, %18, %90 : vector<2x128xi32>
    %c1_50 = arith.constant 1 : index
    %c0_51 = arith.constant 0 : index
    %92 = vector.load %arg6[%c1_50, %c0_51] : memref<16x128xf32, #tpu.memory_space<vmem>>, vector<1x128xf32>
    %cst_52 = arith.constant 0.000000e+00 : f32
    %93 = vector.broadcast %cst_52 : f32 to vector<2x128xf32>
    %94 = arith.select %89, %87, %93 : vector<2x128xi1>, vector<2x128xf32>
    %cst_53 = arith.constant dense<0.000000e+00> : vector<128xf32>
    %95 = vector.multi_reduction <add>, %94, %cst_53 [0] : vector<2x128xf32> to vector<128xf32>
    %96 = vector.shape_cast %95 : vector<128xf32> to vector<1x128xf32>
    %97 = arith.addf %92, %96 : vector<1x128xf32>
    %c1_54 = arith.constant 1 : index
    %c0_55 = arith.constant 0 : index
    %98 = vector.load %arg6[%c1_54, %c0_55] : memref<16x128xf32, #tpu.memory_space<vmem>>, vector<1x128xf32>
    tpu.vector_store %arg6[%c1_54, %c0_55], %97 {strides = array<i32>} : memref<16x128xf32, #tpu.memory_space<vmem>>, vector<1x128xf32>,
    %c4 = arith.constant 4 : index
    %c0_56 = arith.constant 0 : index
    %99 = vector.load %arg6[%c4, %c0_56] : memref<16x128xf32, #tpu.memory_space<vmem>>, vector<1x128xf32>
    %cst_57 = arith.constant dense<0.000000e+00> : vector<128xf32>
    %100 = vector.multi_reduction <add>, %87, %cst_57 [0] : vector<2x128xf32> to vector<128xf32>
    %101 = vector.shape_cast %100 : vector<128xf32> to vector<1x128xf32>
    %102 = arith.addf %99, %101 : vector<1x128xf32>
    %c4_58 = arith.constant 4 : index
    %c0_59 = arith.constant 0 : index
    %103 = vector.load %arg6[%c4_58, %c0_59] : memref<16x128xf32, #tpu.memory_space<vmem>>, vector<1x128xf32>
    tpu.vector_store %arg6[%c4_58, %c0_59], %102 {strides = array<i32>} : memref<16x128xf32, #tpu.memory_space<vmem>>, vector<1x128xf32>,
    %c7 = arith.constant 7 : index
    %c0_60 = arith.constant 0 : index
    %104 = vector.load %arg6[%c7, %c0_60] : memref<16x128xf32, #tpu.memory_space<vmem>>, vector<1x128xf32>
    %105 = arith.extui %89 : vector<2x128xi1> to vector<2x128xi32>
    %106 = arith.sitofp %105 : vector<2x128xi32> to vector<2x128xf32>
    %cst_61 = arith.constant dense<0.000000e+00> : vector<128xf32>
    %107 = vector.multi_reduction <add>, %106, %cst_61 [0] : vector<2x128xf32> to vector<128xf32>
    %108 = vector.shape_cast %107 : vector<128xf32> to vector<1x128xf32>
    %109 = arith.addf %104, %108 : vector<1x128xf32>
    %c7_62 = arith.constant 7 : index
    %c0_63 = arith.constant 0 : index
    %110 = vector.load %arg6[%c7_62, %c0_63] : memref<16x128xf32, #tpu.memory_space<vmem>>, vector<1x128xf32>
    tpu.vector_store %arg6[%c7_62, %c0_63], %109 {strides = array<i32>} : memref<16x128xf32, #tpu.memory_space<vmem>>, vector<1x128xf32>,
    %c10 = arith.constant 10 : index
    %c0_64 = arith.constant 0 : index
    %111 = vector.load %arg6[%c10, %c0_64] : memref<16x128xf32, #tpu.memory_space<vmem>>, vector<1x128xf32>
    %cst_65 = arith.constant 0.000000e+00 : f32
    %112 = vector.broadcast %cst_65 : f32 to vector<2x128xf32>
    %113 = arith.select %91, %87, %112 : vector<2x128xi1>, vector<2x128xf32>
    %cst_66 = arith.constant dense<0.000000e+00> : vector<128xf32>
    %114 = vector.multi_reduction <add>, %113, %cst_66 [0] : vector<2x128xf32> to vector<128xf32>
    %115 = vector.shape_cast %114 : vector<128xf32> to vector<1x128xf32>
    %116 = arith.addf %111, %115 : vector<1x128xf32>
    %c10_67 = arith.constant 10 : index
    %c0_68 = arith.constant 0 : index
    %117 = vector.load %arg6[%c10_67, %c0_68] : memref<16x128xf32, #tpu.memory_space<vmem>>, vector<1x128xf32>
    tpu.vector_store %arg6[%c10_67, %c0_68], %116 {strides = array<i32>} : memref<16x128xf32, #tpu.memory_space<vmem>>, vector<1x128xf32>,
    %c13 = arith.constant 13 : index
    %c0_69 = arith.constant 0 : index
    %118 = vector.load %arg6[%c13, %c0_69] : memref<16x128xf32, #tpu.memory_space<vmem>>, vector<1x128xf32>
    %119 = arith.extui %91 : vector<2x128xi1> to vector<2x128xi32>
    %120 = arith.sitofp %119 : vector<2x128xi32> to vector<2x128xf32>
    %cst_70 = arith.constant dense<0.000000e+00> : vector<128xf32>
    %121 = vector.multi_reduction <add>, %120, %cst_70 [0] : vector<2x128xf32> to vector<128xf32>
    %122 = vector.shape_cast %121 : vector<128xf32> to vector<1x128xf32>
    %123 = arith.addf %118, %122 : vector<1x128xf32>
    %c13_71 = arith.constant 13 : index
    %c0_72 = arith.constant 0 : index
    %124 = vector.load %arg6[%c13_71, %c0_72] : memref<16x128xf32, #tpu.memory_space<vmem>>, vector<1x128xf32>
    tpu.vector_store %arg6[%c13_71, %c0_72], %123 {strides = array<i32>} : memref<16x128xf32, #tpu.memory_space<vmem>>, vector<1x128xf32>,
    %125 = arith.mulf %29, %33 : vector<2x128xf32>
    %c3_i32_73 = arith.constant 3 : i32
    %126 = vector.broadcast %c3_i32_73 : i32 to vector<2x128xi32>
    %127 = arith.cmpi eq, %16, %126 : vector<2x128xi32>
    %c3_i32_74 = arith.constant 3 : i32
    %128 = vector.broadcast %c3_i32_74 : i32 to vector<2x128xi32>
    %129 = arith.cmpi eq, %18, %128 : vector<2x128xi32>
    %c2_75 = arith.constant 2 : index
    %c0_76 = arith.constant 0 : index
    %130 = vector.load %arg6[%c2_75, %c0_76] : memref<16x128xf32, #tpu.memory_space<vmem>>, vector<1x128xf32>
    %cst_77 = arith.constant 0.000000e+00 : f32
    %131 = vector.broadcast %cst_77 : f32 to vector<2x128xf32>
    %132 = arith.select %127, %125, %131 : vector<2x128xi1>, vector<2x128xf32>
    %cst_78 = arith.constant dense<0.000000e+00> : vector<128xf32>
    %133 = vector.multi_reduction <add>, %132, %cst_78 [0] : vector<2x128xf32> to vector<128xf32>
    %134 = vector.shape_cast %133 : vector<128xf32> to vector<1x128xf32>
    %135 = arith.addf %130, %134 : vector<1x128xf32>
    %c2_79 = arith.constant 2 : index
    %c0_80 = arith.constant 0 : index
    %136 = vector.load %arg6[%c2_79, %c0_80] : memref<16x128xf32, #tpu.memory_space<vmem>>, vector<1x128xf32>
    tpu.vector_store %arg6[%c2_79, %c0_80], %135 {strides = array<i32>} : memref<16x128xf32, #tpu.memory_space<vmem>>, vector<1x128xf32>,
    %c5 = arith.constant 5 : index
    %c0_81 = arith.constant 0 : index
    %137 = vector.load %arg6[%c5, %c0_81] : memref<16x128xf32, #tpu.memory_space<vmem>>, vector<1x128xf32>
    %cst_82 = arith.constant dense<0.000000e+00> : vector<128xf32>
    %138 = vector.multi_reduction <add>, %125, %cst_82 [0] : vector<2x128xf32> to vector<128xf32>
    %139 = vector.shape_cast %138 : vector<128xf32> to vector<1x128xf32>
    %140 = arith.addf %137, %139 : vector<1x128xf32>
    %c5_83 = arith.constant 5 : index
    %c0_84 = arith.constant 0 : index
    %141 = vector.load %arg6[%c5_83, %c0_84] : memref<16x128xf32, #tpu.memory_space<vmem>>, vector<1x128xf32>
    tpu.vector_store %arg6[%c5_83, %c0_84], %140 {strides = array<i32>} : memref<16x128xf32, #tpu.memory_space<vmem>>, vector<1x128xf32>,
    %c8 = arith.constant 8 : index
    %c0_85 = arith.constant 0 : index
    %142 = vector.load %arg6[%c8, %c0_85] : memref<16x128xf32, #tpu.memory_space<vmem>>, vector<1x128xf32>
    %143 = arith.extui %127 : vector<2x128xi1> to vector<2x128xi32>
    %144 = arith.sitofp %143 : vector<2x128xi32> to vector<2x128xf32>
    %cst_86 = arith.constant dense<0.000000e+00> : vector<128xf32>
    %145 = vector.multi_reduction <add>, %144, %cst_86 [0] : vector<2x128xf32> to vector<128xf32>
    %146 = vector.shape_cast %145 : vector<128xf32> to vector<1x128xf32>
    %147 = arith.addf %142, %146 : vector<1x128xf32>
    %c8_87 = arith.constant 8 : index
    %c0_88 = arith.constant 0 : index
    %148 = vector.load %arg6[%c8_87, %c0_88] : memref<16x128xf32, #tpu.memory_space<vmem>>, vector<1x128xf32>
    tpu.vector_store %arg6[%c8_87, %c0_88], %147 {strides = array<i32>} : memref<16x128xf32, #tpu.memory_space<vmem>>, vector<1x128xf32>,
    %c11 = arith.constant 11 : index
    %c0_89 = arith.constant 0 : index
    %149 = vector.load %arg6[%c11, %c0_89] : memref<16x128xf32, #tpu.memory_space<vmem>>, vector<1x128xf32>
    %cst_90 = arith.constant 0.000000e+00 : f32
    %150 = vector.broadcast %cst_90 : f32 to vector<2x128xf32>
    %151 = arith.select %129, %125, %150 : vector<2x128xi1>, vector<2x128xf32>
    %cst_91 = arith.constant dense<0.000000e+00> : vector<128xf32>
    %152 = vector.multi_reduction <add>, %151, %cst_91 [0] : vector<2x128xf32> to vector<128xf32>
    %153 = vector.shape_cast %152 : vector<128xf32> to vector<1x128xf32>
    %154 = arith.addf %149, %153 : vector<1x128xf32>
    %c11_92 = arith.constant 11 : index
    %c0_93 = arith.constant 0 : index
    %155 = vector.load %arg6[%c11_92, %c0_93] : memref<16x128xf32, #tpu.memory_space<vmem>>, vector<1x128xf32>
    tpu.vector_store %arg6[%c11_92, %c0_93], %154 {strides = array<i32>} : memref<16x128xf32, #tpu.memory_space<vmem>>, vector<1x128xf32>,
    %c14 = arith.constant 14 : index
    %c0_94 = arith.constant 0 : index
    %156 = vector.load %arg6[%c14, %c0_94] : memref<16x128xf32, #tpu.memory_space<vmem>>, vector<1x128xf32>
    %157 = arith.extui %129 : vector<2x128xi1> to vector<2x128xi32>
    %158 = arith.sitofp %157 : vector<2x128xi32> to vector<2x128xf32>
    %cst_95 = arith.constant dense<0.000000e+00> : vector<128xf32>
    %159 = vector.multi_reduction <add>, %158, %cst_95 [0] : vector<2x128xf32> to vector<128xf32>
    %160 = vector.shape_cast %159 : vector<128xf32> to vector<1x128xf32>
    %161 = arith.addf %156, %160 : vector<1x128xf32>
    %c14_96 = arith.constant 14 : index
    %c0_97 = arith.constant 0 : index
    %162 = vector.load %arg6[%c14_96, %c0_97] : memref<16x128xf32, #tpu.memory_space<vmem>>, vector<1x128xf32>
    tpu.vector_store %arg6[%c14_96, %c0_97], %161 {strides = array<i32>} : memref<16x128xf32, #tpu.memory_space<vmem>>, vector<1x128xf32>,
    %c15 = arith.constant 15 : index
    %c0_98 = arith.constant 0 : index
    %163 = vector.load %arg6[%c15, %c0_98] : memref<16x128xf32, #tpu.memory_space<vmem>>, vector<1x128xf32>
    %164 = arith.subf %35, %48 : vector<2x128xf32>
    %cst_99 = arith.constant dense<0.000000e+00> : vector<128xf32>
    %165 = vector.multi_reduction <add>, %164, %cst_99 [0] : vector<2x128xf32> to vector<128xf32>
    %166 = vector.shape_cast %165 : vector<128xf32> to vector<1x128xf32>
    %167 = arith.addf %163, %166 : vector<1x128xf32>
    %c15_100 = arith.constant 15 : index
    %c0_101 = arith.constant 0 : index
    %168 = vector.load %arg6[%c15_100, %c0_101] : memref<16x128xf32, #tpu.memory_space<vmem>>, vector<1x128xf32>
    tpu.vector_store %arg6[%c15_100, %c0_101], %167 {strides = array<i32>} : memref<16x128xf32, #tpu.memory_space<vmem>>, vector<1x128xf32>,
    %c0_i32_102 = arith.constant 0 : i32
    %169 = arith.cmpi eq, %arg1, %c0_i32_102 : i32
    %170 = arith.extui %169 : i1 to i32
    %c0_i32_103 = arith.constant 0 : i32
    %171 = arith.cmpi ne, %170, %c0_i32_103 : i32
    scf.if %171 {
      %c0_104 = arith.constant 0 : index
      %c0_105 = arith.constant 0 : index
      %172 = vector.load %arg6[%c0_104, %c0_105] : memref<16x128xf32, #tpu.memory_space<vmem>>, vector<16x128xf32>
      %c0_106 = arith.constant 0 : index
      %c0_107 = arith.constant 0 : index
      %c0_108 = arith.constant 0 : index
      %173 = vector.load %arg5[%c0_106, %c0_107, %c0_108] : memref<1x16x128xf32, #tpu.memory_space<vmem>>, vector<1x16x128xf32>
      %174 = vector.shape_cast %173 : vector<1x16x128xf32> to vector<16x128xf32>
      %175 = vector.shape_cast %172 : vector<16x128xf32> to vector<1x16x128xf32>
      tpu.vector_store %arg5[%c0_106, %c0_107, %c0_108], %175 {strides = array<i32>} : memref<1x16x128xf32, #tpu.memory_space<vmem>>, vector<1x16x128xf32>,
    } else {
    }
    return
  }
  func.func @transform_0(%arg0: i32, %arg1: i32) -> (i32, i32, i32, i32) {
    %c0_i32 = arith.constant 0 : i32
    %c0_i32_0 = arith.constant 0 : i32
    %c0_i32_1 = arith.constant 0 : i32
    return %arg0, %c0_i32, %arg1, %c0_i32_0 : i32, i32, i32, i32
  }
  func.func @transform_1(%arg0: i32, %arg1: i32) -> (i32, i32, i32, i32) {
    %c0_i32 = arith.constant 0 : i32
    %c0_i32_0 = arith.constant 0 : i32
    %c0_i32_1 = arith.constant 0 : i32
    return %arg0, %c0_i32, %arg1, %c0_i32_0 : i32, i32, i32, i32
  }
  func.func @transform_2(%arg0: i32, %arg1: i32) -> (i32, i32, i32, i32) {
    %c0_i32 = arith.constant 0 : i32
    %c0_i32_0 = arith.constant 0 : i32
    %c0_i32_1 = arith.constant 0 : i32
    return %arg0, %c0_i32, %arg1, %c0_i32_0 : i32, i32, i32, i32
  }
  func.func @transform_3(%arg0: i32, %arg1: i32) -> (i32, i32, i32) {
    %c0_i32 = arith.constant 0 : i32
    %c0_i32_0 = arith.constant 0 : i32
    %c0_i32_1 = arith.constant 0 : i32
    return %arg0, %c0_i32, %c0_i32_0 : i32, i32, i32
  }
}

</mosaic_0001>

<bundles_post_ra>
// kernel: tpu_custom_call.1
= control target key start
LH: loop header
LB: loop body
LE: loop exit
PB: predicated region body
PF: predicated region fallthrough
CT: control target
= control target key end

     0   :  { %8 = vsyncpa [#allocation4], 0  ;;  %s1266_s0 = inlined_call_operand.hbm [shape: bf16[2,4,2,128], index: 0, kind: input, shape index: {}]   ;;  %s1267_s1 = inlined_call_operand.hbm [shape: s32[2,1,2,128], index: 1, kind: input, shape index: {}]   ;;  %s1268_s2 = inlined_call_operand.vmem [shape: s32[2,1,2,128], index: 2, kind: input, shape index: {}]   ;;  %s1269_s3 = inlined_call_operand.hbm [shape: f32[2,16,128], index: 3, kind: output, shape index: {}]  }
   0x1   :  { %10 = vsyncpa [#allocation4 + $0x1], 0 }
   0x2   :  { %11 = vsyncpa [#allocation7], 0 }
   0x3   :  { %13 = vsyncpa [#allocation7 + $0x1], 0 }
   0x4   :  { %14 = vsyncpa [#allocation5], 0 }
   0x5   :  { %16 = vsyncpa [#allocation5 + $0x1], 0  ;;  %s940_s12 = smov 0   ;;  %s942_s13 = smov 0  }
   0x6   :  { %s944_s14 = smov 0   ;;  %s946_s15 = smov 0  }
   0x7   :  { %s948_s16 = smov 0   ;;  %s950_s17 = smov 0  }
   0x8 LB: > { %s650_s18 = sadd.s32 4294967295, %s910_s17   ;;  %s651_s19 = sadd.s32 4294967294, %s910_s17   ;;  %s910_s17 = sphi %s950_s17, %s22_s17   ;;  %s906_s16 = sphi %s948_s16, %s1288_s16   ;;  %s902_s15 = sphi %s946_s15, %s1287_s15   ;;  %s898_s14 = sphi %s944_s14, %s1286_s14   ;;  %s894_s13 = sphi %s942_s13, %s1285_s13   ;;  %s890_s12 = sphi %s940_s12, %s1284_s12  }
   0x9   : > { %s34_s20 = sadd.s32 1, %s906_s16  ;;  %s43_s21 = sadd.s32 1, %s898_s14 }
   0xa   : > { %p36_p0 = scmp.ge.s32.totalorder %s34_s20, 2  ;;  %p50_p1 = scmp.ne.s32.totalorder %s898_s14, %s894_s13 }
   0xb   : > { %p51_p2 = scmp.eq.s32.totalorder %s910_s17, 0  ;;  %p56_p3 = scmp.ne.s32.totalorder %s894_s13, %s890_s12 }
   0xc   : > { %s1290_s20 = smov (%p36_p0, %s34_s20), 0  ;;  %p57_p5 = scmp.eq.s32.totalorder %s650_s18, 0 }
   0xd   : > { %p981_p4 = por %p51_p2, %p50_p1  ;;  %s38_s23 = ssub.s32 %s906_s16, %s1290_s20 }
   0xe   : > { %p136_p6 = scmp.eq.s32.totalorder %s650_s18, 1  ;;  %p41_p7 = scmp.eq.s32.totalorder %s38_s23, 0 }
   0xf   : > { %p987_p8 = por %p57_p5, %p56_p3  ;;  %p142_p10 = scmp.eq.s32.totalorder %s651_s19, 1 }
  0x10   : > { %p991_p9 = por %p136_p6, %p50_p1  ;;  %p697_p13 = scmp.lt.s32.totalorder %s910_s17, 2 }
  0x11   : > { %s1273_s24 = scalar_select %p987_p8, 1, 0 }
  0x12   : > { %s1274_s25 = scalar_select %p991_p9, 1, 0 }
  0x13   : > { %s996_s26 = scalar_select %p41_p7, %s898_s14, %s43_s21  }
  0x14   : > { %p998_p11 = por %p142_p10, %p56_p3  ;;  %s1005_s28 = sand.u32 1, %s898_s14  }
  0x15   : > { %s654_s29 = sshll.u32 %s1005_s28, 2  ;;  %s678_s30 = sshll.u32 %s906_s16, 6 }
  0x16   : > { %s1275_s27 = scalar_select %p998_p11, 1, 0 }
  0x17   : > { %s1012_s6 = scalar_lea.hbm %s1266_s0, %s678_s30  ;;  %s166_s7 = scalar_lea.vmem [#allocation3], %s654_s29 }
  0x18   : > { %s174_s8 = sshll.u32 %s166_s7, 4  ;;  %p1018_p0 = pnand %p697_p13, %p981_p4  ;;  %s1014_s8 = int_to_ptr.vmem [resolvable:$true] %s174_s8 }
  0x19   : > { %s163_s10 = scalar_lea.sflag [#allocation4], %s1005_s28  ;;  %s764_s11 = scalar_lea.hbm %s1012_s6, 64 }
  0x1a   : > { %p765_p2 = scmp.ne.s32.totalorder %s1012_s6, %s764_s11  ;;  %p766_p3 = pneg %p1018_p0 }
  0x1b   : > { %s769_s21 = scalar_lea.hbm %s1266_s0, 128  ;;  %p770_p4 = scmp.lt.u32.totalorder %s1012_s6, %s1266_s0 }
  0x1c   : > { %p767_p5 = pnand %p766_p3, %p765_p2  ;;  %p771_p7 = scmp.lt.u32.totalorder %s769_s21, %s764_s11 }
  0x1d   : > { %p773_p13 = scmp.lt.u32.totalorder %s764_s11, %s1012_s6 }
  0x1e   : > { %p768_p6 = pneg %p767_p5  ;;  %p772_p10 = por %p771_p7, %p770_p4 }
  0x20   : > { %p774_p12 = por %p773_p13, %p772_p10 }
  0x22   : > { %p775_p1 = pnand %p774_p12, %p768_p6 }
  0x24   : > { %778 = shalt.err (!%p775_p1)
}
  0x25   : > { %s779_s29 = scalar_lea.vmem %s1014_s8, 64  ;;  %s912_s30 = smov [#allocation3]  }
  0x26   : > { %p780_p2 = scmp.ne.s32.totalorder %s1014_s8, %s779_s29  ;;  %s784_s4 = sshll.u32 %s912_s30, 4  ;;  %s785_s4 = int_to_ptr.vmem [resolvable:$false] %s784_s4 }
  0x27   : > { %s786_s5 = scalar_lea.vmem %s785_s4, 128  ;;  %p787_p9 = scmp.lt.s32.totalorder %s1014_s8, %s785_s4 }
  0x28   : > { %p782_p5 = pnand %p780_p2, %p766_p3  ;;  %p788_p4 = scmp.lt.s32.totalorder %s786_s5, %s779_s29 }
  0x2a   : > { %p783_p11 = pneg %p782_p5  ;;  %p789_p7 = por %p788_p4, %p787_p9 }
  0x2c   : > { %p790_p10 = pnand %p789_p7, %p783_p11 }
  0x2e   : > { %793 = shalt.err (!%p790_p10)
}
  0x2f   : > { %s913_s7 = smov 16   ;;  %s914_s11 = smov 1  }
  0x30   : > { %689 = dma.hbm_to_vmem [thread:$0]  (!%p1018_p0), %s1012_s6, 64, %s1014_s8, %s163_s10, %s913_s7, %s913_s7, %s914_s11  }
  0x31   : > { %p211_p12 = scmp.lt.s32.totalorder %s910_s17, 3  ;;  %s657_s18 = sshll.u32 %s1005_s28, 1 }
  0x32   : > { %s658_s19 = sshll.u32 %s906_s16, 5  ;;  %p1277_p9 = scmp.ge.s32.totalorder %s910_s17, 1 }
  0x33   : > { %s1063_s29 = scalar_lea.hbm %s1267_s1, %s658_s19  ;;  %s188_s30 = scalar_lea.vmem [#allocation6], %s657_s18 }
  0x34   : > { %p1056_p11 = pnand %p1277_p9, %p211_p12  ;;  %s196_s4 = sshll.u32 %s188_s30, 4  ;;  %s197_s4 = int_to_ptr.vmem [resolvable:$true] %s196_s4 }
  0x35   : > { %s185_s6 = scalar_lea.sflag [#allocation7], %s1005_s28  ;;  %s794_s8 = scalar_lea.hbm %s1063_s29, 32 }
  0x36   : > { %s1278_s21 = scalar_select %p1056_p11, 1, 0 }
  0x37   : > { %p795_p1 = scmp.ne.s32.totalorder %s1063_s29, %s794_s8  ;;  %s799_s7 = scalar_lea.hbm %s1267_s1, 64 }
  0x38   : > { %p800_p2 = scmp.lt.u32.totalorder %s1063_s29, %s1267_s1  ;;  %p801_p5 = scmp.lt.u32.totalorder %s799_s7, %s794_s8 }
  0x39   : > { %p797_p6 = pnand %p795_p1, %p766_p3  ;;  %p803_p7 = scmp.lt.u32.totalorder %s794_s8, %s1063_s29 }
  0x3a   : > { %p802_p4 = por %p801_p5, %p800_p2 }
  0x3b   : > { %p798_p13 = pneg %p797_p6 }
  0x3c   : > { %p804_p10 = por %p803_p7, %p802_p4 }
  0x3e   : > { %p805_p12 = pnand %p804_p10, %p798_p13 }
  0x40   : > { %808 = shalt.err (!%p805_p12)
}
  0x41   : > { %s809_s28 = scalar_lea.vmem %s197_s4, 32  ;;  %s915_s18 = smov [#allocation6]  }
  0x42   : > { %p810_p9 = scmp.ne.s32.totalorder %s197_s4, %s809_s28  ;;  %s814_s22 = sshll.u32 %s915_s18, 4  ;;  %s815_s22 = int_to_ptr.vmem [resolvable:$false] %s814_s22 }
  0x43   : > { %s816_s23 = scalar_lea.vmem %s815_s22, 64  ;;  %p817_p8 = scmp.lt.s32.totalorder %s197_s4, %s815_s22 }
  0x44   : > { %p812_p1 = pnand %p810_p9, %p766_p3  ;;  %p818_p11 = scmp.lt.s32.totalorder %s816_s23, %s809_s28 }
  0x46   : > { %p813_p6 = pneg %p812_p1  ;;  %p819_p2 = por %p818_p11, %p817_p8 }
  0x48   : > { %p820_p5 = pnand %p819_p2, %p813_p6 }
  0x4a   : > { %823 = shalt.err (!%p820_p5)
}
  0x4b   : > { %692 = dma.hbm_to_vmem [thread:$0]  (!%p1018_p0), %s1063_s29, 32, %s197_s4, %s185_s6  }
  0x4c   : > { %p1279_p13 = scmp.ne.s32.totalorder %s1278_s21, 0 }
  0x4d   : > { %s1088_s30 = sand.u32 (!%p1279_p13), 1, %s894_s13   ;;  %p1280_p3 = scmp.ne.s32.totalorder (!%p1279_p13), %s1273_s24, 0 }
  0x4e   : > { %215 = sbr.rel (%p1279_p13) target bundleno = 192 (0xc0), region = 32  ;;  %s660_s8 = sshll.u32 (!%p1279_p13), %s1088_s30, 2 }
  0x4f   : > { %s218_s10 = scalar_lea.sflag (!%p1279_p13), [#allocation4], %s1088_s30  ;;  %s221_s5 = scalar_lea.vmem (!%p1279_p13), [#allocation3], %s660_s8 }
  0x55   : > { %877 = dma.done.wait (%p1280_p3), %s218_s10, 64  }
  0x56   : > { %879 = vsyncadd (%p1280_p3), %s218_s10, 4294967232  ;;  %s661_s9 = sshll.u32 %s1088_s30, 1  ;;  %s227_s21 = scalar_lea.sflag [#allocation7], %s1088_s30 }
  0x57   : > { %s230_s29 = scalar_lea.vmem [#allocation6], %s661_s9 }
  0x58   : > { %881 = dma.done.wait (%p1280_p3), %s227_s21, 32  }
  0x59   : > { %883 = vsyncadd (%p1280_p3), %s227_s21, 4294967264  ;;  %p265_p8 = scmp.lt.s32.totalorder %s902_s15, 1  ;;  %v916_v0 = vmov 0.0   ;;  %v278_v1 = vld [vmem:[%s221_s5] sm:$0x1]  ;;  %vm325_vm0 = vcmask 1041408  }
  0x5a   : > { %276 = vst [vmem:[#allocation2] sm:$0xff] %v916_v0  ;;  %277 = vst [vmem:[#allocation2 + $0x8] sm:$0xff] %v916_v0  ;;  %v664_v2 = vld [vmem:[%s221_s5 + $0x1] sm:$0x1]  ;;  %v665_v3 = vld [vmem:[%s221_s5 + $0x2] sm:$0x1]  ;;  %v1109_v4 = vunpack.c.l.bf16 %v278_v1 }
  0x5b   : > { %s266_s4 = scalar_select %p265_p8, %s902_s15, 1  ;;  %v1111_v5 = vunpack.c.l.bf16 %v664_v2  ;;  %v1113_v6 = vunpack.c.l.bf16 %v665_v3  ;;  %v666_v7 = vld [vmem:[%s221_s5 + $0x3] sm:$0x1]  ;;  %v1115_v8 = vld [vmem:[%s230_s29] sm:$0x3] }
  0x5c   : > { %vm315_vm1 = vcmp.eq.s32.totalorder %v1115_v8, 1  ;;  %v1118_v9 = vunpack.c.l.bf16 %v666_v7  ;;  %vm317_vm3 = vcmp.eq.s32.totalorder %v1115_v8, 2  ;;  %vm319_vm5 = vcmp.eq.s32.totalorder %v1115_v8, 3  ;;  %s662_s24 = sshll.u32 %s1088_s30, 4  ;;  %s679_s22 = sshll.u32 %s902_s15, 8 }
  0x5d   : > { %s663_s6 = sshll.u32 %s266_s4, 1  ;;  %v291_v10 = vmax.f32 %v1109_v4, %v1111_v5  ;;  %v667_v11 = vsel %vm315_vm1, 1.0, %v916_v0  ;;  %v669_v18 = vsel %vm317_vm3, 1.0, %v916_v0  ;;  %v671_v41 = vsel %vm319_vm5, 1.0, %v916_v0  ;;  %s264_s28 = scalar_lea.vmem [#allocation8], %s662_s24 }
  0x5e   : > { %s271_s19 = scalar_lea.vmem %s1268_s2, %s663_s6  ;;  %v348_v13 = vsel %vm325_vm0, %v667_v11, 0.0  ;;  %v406_v22 = vsel %vm325_vm0, %v669_v18, 0.0  ;;  %v464_v47 = vsel %vm325_vm0, %v671_v41, 0.0  ;;  %vm313_vm7 = vcmp.eq.s32.totalorder %v1115_v8, 0  ;;  %s528_s18 = sshll.u32 %s264_s28, 4  ;;  %s1212_s18 = int_to_ptr.vmem [resolvable:$true] %s528_s18 }
  0x5f   : > { %v1125_v12 = vld [vmem:[%s271_s19] sm:$0x3]  ;;  %v292_v14 = vmax.f32 %v291_v10, %v1113_v6  ;;  %v349_v15 = vrot.slane %v348_v13, 4  ;;  %v407_v23 = vrot.slane %v406_v22, 4  ;;  %v465_v55 = vrot.slane %v464_v47, 4  ;;  %s1217_s10 = scalar_lea.hbm %s1269_s3, %s679_s22  ;;  %s515_s5 = scalar_lea.sflag [#allocation5], %s1088_s30 }
  0x60   : > { %vm322_vm2 = vcmp.eq.s32.totalorder %v1125_v12, 1  ;;  %vm381_vm4 = vcmp.eq.s32.totalorder %v1125_v12, 2  ;;  %vm439_vm6 = vcmp.eq.s32.totalorder %v1125_v12, 3  ;;  %s824_s9 = scalar_lea.vmem %s1212_s18, 256  ;;  %p1281_p11 = scmp.ne.s32.totalorder %s1274_s25, 0 }
  0x61   : > { %v668_v16 = vsel %vm322_vm2, 1.0, %v916_v0  ;;  %v1140_v19 = vmax.f32 %v292_v14, %v1118_v9  ;;  %v350_v20 = vadd.f32 %v349_v15, %v348_v13  ;;  %v670_v24 = vsel %vm381_vm4, 1.0, %v916_v0  ;;  %v345_v45 = vld [vmem:[#allocation2 + $0x6] sm:$0x1]  ;;  %v368_v50 = vld [vmem:[#allocation2 + $0xc] sm:$0x1]  ;;  %p825_p0 = scmp.ne.s32.totalorder %s1212_s18, %s824_s9 }
  0x62   : > { %v371_v17 = vsel %vm325_vm0, %v668_v16, 0.0  ;;  %v408_v31 = vadd.f32 %v407_v23, %v406_v22  ;;  %v429_v32 = vsel %vm325_vm0, %v670_v24, 0.0  ;;  %v672_v48 = vsel %vm439_vm6, 1.0, %v916_v0  ;;  %v403_v53 = vld [vmem:[#allocation2 + $0x7] sm:$0x1]  ;;  %s917_s21 = smov [#allocation8]  }
  0x63   : > { %v372_v21 = vrot.slane %v371_v17, 4  ;;  %v294_v25 = vsub.f32 %v1109_v4, %v1140_v19  ;;  %v297_v26 = vsub.f32 %v1111_v5, %v1140_v19  ;;  %v300_v27 = vsub.f32 %v1113_v6, %v1140_v19  ;;  %v426_v7 = vld [vmem:[#allocation2 + $0xd] sm:$0x1]  ;;  %v461_v23 = vld [vmem:[#allocation2 + $0x8] sm:$0x1]  ;;  %p826_p4 = pnand %p825_p0, %p1281_p11  ;;  %s828_s15 = sshll.u32 %s917_s21, 4  ;;  %s829_s15 = int_to_ptr.vmem [resolvable:$false] %s828_s15 }
  0x64   : > { %v303_v28 = vsub.f32 %v1118_v9, %v1140_v19  ;;  %v351_v29 = vrot.slane %v350_v20, 2  ;;  %v409_v39 = vrot.slane %v408_v31, 2  ;;  %v430_v40 = vrot.slane %v429_v32, 4  ;;  %s830_s29 = scalar_lea.vmem %s829_s15, 512  ;;  %p831_p10 = scmp.lt.s32.totalorder %s1212_s18, %s829_s15 }
  0x65   : > { %v373_v30 = vadd.f32 %v372_v21, %v371_v17  ;;  %v295_v33 = vmul.f32 1.442695, %v294_v25  ;;  %v298_v34 = vmul.f32 1.442695, %v297_v26  ;;  %v301_v35 = vmul.f32 1.442695, %v300_v27  ;;  %p827_p7 = pneg %p826_p4  ;;  %p832_p12 = scmp.lt.s32.totalorder %s830_s29, %s824_s9 }
  0x66   : > { %v304_v36 = vmul.f32 1.442695, %v303_v28  ;;  %v352_v37 = vadd.f32 %v351_v29, %v350_v20  ;;  %v410_v44 = vadd.f32 %v409_v39, %v408_v31  ;;  %v431_v46 = vadd.f32 %v430_v40, %v429_v32  ;;  %v484_v27 = vld [vmem:[#allocation2 + $0xe] sm:$0x1] }
  0x67   : > { %v374_v38 = vrot.slane %v373_v30, 2  ;;  %752 = vpow2.f32 %v295_v33  ;;  %v487_v56 = vsel %vm325_vm0, %v672_v48, 0.0  ;;  %v466_v62 = vadd.f32 %v465_v55, %v464_v47  ;;  %p833_p9 = por %p832_p12, %p831_p10 }
  0x68   : > { %754 = vpow2.f32 %v298_v34  ;;  %v353_v42 = vrot.slane %v352_v37, 1  ;;  %v411_v52 = vrot.slane %v410_v44, 1  ;;  %v432_v54 = vrot.slane %v431_v46, 2 }
  0x69   : > { %v375_v43 = vadd.f32 %v374_v38, %v373_v30  ;;  %756 = vpow2.f32 %v301_v35  ;;  %v488_v60 = vrot.slane %v487_v56, 4  ;;  %v467_v3 = vrot.slane %v466_v62, 2  ;;  %p834_p1 = pnand %p833_p9, %p827_p7 }
  0x6a   : > { %758 = vpow2.f32 %v304_v36  ;;  %v354_v49 = vadd.f32 %v353_v42, %v352_v37  ;;  %v412_v59 = vadd.f32 %v411_v52, %v410_v44  ;;  %v433_v61 = vadd.f32 %v432_v54, %v431_v46 }
  0x6b   : > { %v376_v51 = vrot.slane %v375_v43, 1  ;;  %v489_v0 = vadd.f32 %v488_v60, %v487_v56  ;;  %v468_v14 = vadd.f32 %v467_v3, %v466_v62  ;;  %v314_v32 = vsel %vm313_vm7, %v1109_v4, 0.0 }
  0x6c   : > { %v355_v57 = vadd.f32 %v354_v49, %v345_v45  ;;  %v413_v1 = vadd.f32 %v412_v59, %v403_v53  ;;  %v434_v2 = vrot.slane %v433_v61, 1  ;;  %v316_v33 = vsel %vm315_vm1, %v1111_v5, %v314_v32 }
  0x6d   : > { %v377_v58 = vadd.f32 %v376_v51, %v375_v43  ;;  %v490_v10 = vrot.slane %v489_v0, 2  ;;  %v469_v21 = vrot.slane %v468_v14, 1  ;;  %v318_v34 = vsel %vm317_vm3, %v1113_v6, %v316_v33 }
  0x6e   : > { %356 = vst [vmem:[#allocation2 + $0x6] sm:$0x1] %v355_v57  ;;  %414 = vst [vmem:[#allocation2 + $0x7] sm:$0x1] %v413_v1  ;;  %v435_v13 = vadd.f32 %v434_v2, %v433_v61  ;;  %v1180_v4 = vsel %vm319_vm5, %v1118_v9, %v318_v34 }
  0x6f   : > { %v378_v63 = vadd.f32 %v377_v58, %v368_v50  ;;  %v491_v16 = vadd.f32 %v490_v10, %v489_v0  ;;  %v470_v26 = vadd.f32 %v469_v21, %v468_v14 }
  0x70   : > { %v436_v20 = vadd.f32 %v435_v13, %v426_v7 }
  0x71   : > { %379 = vst [vmem:[#allocation2 + $0xc] sm:$0x1] %v378_v63  ;;  %v753_v11 = vpop.eup %752  ;;  %v492_v24 = vrot.slane %v491_v16, 1  ;;  %v471_v30 = vadd.f32 %v470_v26, %v461_v23 }
  0x72   : > { %v755_v15 = vpop.eup %754  ;;  %437 = vst [vmem:[#allocation2 + $0xd] sm:$0x1] %v436_v20 }
  0x73   : > { %v757_v17 = vpop.eup %756  ;;  %v306_v18 = vadd.f32 %v755_v15, %v753_v11  ;;  %v493_v28 = vadd.f32 %v492_v24, %v491_v16  ;;  %472 = vst [vmem:[#allocation2 + $0x8] sm:$0x1] %v471_v30 }
  0x74   : > { %v759_v22 = vpop.eup %758 }
  0x75   : > { %v307_v25 = vadd.f32 %v757_v17, %v306_v18  ;;  %v494_v31 = vadd.f32 %v493_v28, %v484_v27  ;;  %v357_v27 = vld [vmem:[#allocation2 + $0x9] sm:$0x1]  ;;  %v382_v28 = vld [vmem:[#allocation2 + $0x1] sm:$0x1] }
  0x77   : > { %v308_v29 = vadd.f32 %v759_v22, %v307_v25  ;;  %495 = vst [vmem:[#allocation2 + $0xe] sm:$0x1] %v494_v31 }
  0x79   : > { %760 = vrcp.f32 %v308_v29 }
  0x7a   : > { %762 = vlog2.f32 %v308_v29 }
  0x83   : > { %v761_v35 = vpop.eup %760 }
  0x84   : > { %v763_v36 = vpop.eup %762  ;;  %v321_v37 = vmul.f32 %v761_v35, %v755_v15  ;;  %v380_v38 = vmul.f32 %v761_v35, %v757_v17  ;;  %v1173_v39 = vmul.f32 %v761_v35, %v759_v22  ;;  %v323_v15 = vld [vmem:[#allocation2] sm:$0x1]  ;;  %v335_v22 = vld [vmem:[#allocation2 + $0x3] sm:$0x1]  ;;  %v393_v35 = vld [vmem:[#allocation2 + $0x4] sm:$0x1] }
  0x85   : > { %v1175_v40 = vmul.f32 0.6931472, %v763_v36 }
  0x86   : > { %v324_v5 = vsel %vm315_vm1, %v321_v37, 0.0  ;;  %v336_v41 = vsel %vm325_vm0, %v321_v37, 0.0  ;;  %v358_v6 = vsel %vm322_vm2, %v321_v37, 0.0  ;;  %v383_v42 = vsel %vm317_vm3, %v380_v38, 0.0 }
  0x87   : > { %v326_v43 = vsel %vm325_vm0, %v324_v5, 0.0  ;;  %v337_v44 = vrot.slane %v336_v41, 4  ;;  %v359_v45 = vsel %vm325_vm0, %v358_v6, 0.0  ;;  %v384_v46 = vsel %vm325_vm0, %v383_v42, 0.0 }
  0x88   : > { %v327_v9 = vrot.slane %v326_v43, 4  ;;  %v360_v47 = vrot.slane %v359_v45, 4  ;;  %v385_v48 = vrot.slane %v384_v46, 4  ;;  %v394_v49 = vsel %vm325_vm0, %v380_v38, 0.0 }
  0x89   : > { %v338_v50 = vadd.f32 %v337_v44, %v336_v41  ;;  %v395_v51 = vrot.slane %v394_v49, 4  ;;  %v416_v52 = vsel %vm381_vm4, %v380_v38, 0.0  ;;  %v441_v53 = vsel %vm319_vm5, %v1173_v39, 0.0  ;;  %v415_v44 = vld [vmem:[#allocation2 + $0xa] sm:$0x1] }
  0x8a   : > { %v328_v54 = vadd.f32 %v327_v9, %v326_v43  ;;  %v361_v55 = vadd.f32 %v360_v47, %v359_v45  ;;  %v386_v56 = vadd.f32 %v385_v48, %v384_v46  ;;  %v417_v57 = vsel %vm325_vm0, %v416_v52, 0.0  ;;  %v440_v47 = vld [vmem:[#allocation2 + $0x2] sm:$0x1] }
  0x8b   : > { %v339_v58 = vrot.slane %v338_v50, 2  ;;  %v396_v59 = vadd.f32 %v395_v51, %v394_v49  ;;  %v418_v60 = vrot.slane %v417_v57, 4  ;;  %v442_v61 = vsel %vm325_vm0, %v441_v53, 0.0 }
  0x8c   : > { %v329_v62 = vrot.slane %v328_v54, 2  ;;  %v362_v63 = vrot.slane %v361_v55, 2  ;;  %v387_v1 = vrot.slane %v386_v56, 2  ;;  %v443_v0 = vrot.slane %v442_v61, 4 }
  0x8d   : > { %v340_v2 = vadd.f32 %v339_v58, %v338_v50  ;;  %v397_v3 = vrot.slane %v396_v59, 2  ;;  %v419_v7 = vadd.f32 %v418_v60, %v417_v57  ;;  %v452_v8 = vsel %vm325_vm0, %v1173_v39, 0.0  ;;  %v451_v57 = vld [vmem:[#allocation2 + $0x5] sm:$0x1] }
  0x8e   : > { %v330_v10 = vadd.f32 %v329_v62, %v328_v54  ;;  %v363_v11 = vadd.f32 %v362_v63, %v361_v55  ;;  %v388_v13 = vadd.f32 %v387_v1, %v386_v56  ;;  %v444_v14 = vadd.f32 %v443_v0, %v442_v61  ;;  %v473_v0 = vld [vmem:[#allocation2 + $0xb] sm:$0x1] }
  0x8f   : > { %v341_v16 = vrot.slane %v340_v2, 1  ;;  %v398_v17 = vadd.f32 %v397_v3, %v396_v59  ;;  %v420_v18 = vrot.slane %v419_v7, 2  ;;  %v453_v20 = vrot.slane %v452_v8, 4 }
  0x90   : > { %v331_v21 = vrot.slane %v330_v10, 1  ;;  %v364_v23 = vrot.slane %v363_v11, 1  ;;  %v389_v24 = vrot.slane %v388_v13, 1  ;;  %v445_v25 = vrot.slane %v444_v14, 2 }
  0x91   : > { %v342_v26 = vadd.f32 %v341_v16, %v340_v2  ;;  %v399_v29 = vrot.slane %v398_v17, 1  ;;  %v421_v30 = vadd.f32 %v420_v18, %v419_v7  ;;  %v454_v31 = vadd.f32 %v453_v20, %v452_v8  ;;  %v496_v8 = vld [vmem:[#allocation2 + $0xf] sm:$0x1] }
  0x92   : > { %v332_v32 = vadd.f32 %v331_v21, %v330_v10  ;;  %v365_v33 = vadd.f32 %v364_v23, %v363_v11  ;;  %v390_v34 = vadd.f32 %v389_v24, %v388_v13  ;;  %v446_v36 = vadd.f32 %v445_v25, %v444_v14 }
  0x93   : > { %v343_v37 = vadd.f32 %v342_v26, %v335_v22  ;;  %v400_v38 = vadd.f32 %v399_v29, %v398_v17  ;;  %v422_v5 = vrot.slane %v421_v30, 1  ;;  %v455_v41 = vrot.slane %v454_v31, 2 }
  0x94   : > { %v333_v6 = vadd.f32 %v332_v32, %v323_v15  ;;  %v366_v42 = vadd.f32 %v365_v33, %v357_v27  ;;  %v391_v43 = vadd.f32 %v390_v34, %v382_v28  ;;  %v447_v45 = vrot.slane %v446_v36, 1 }
  0x95   : > { %344 = vst [vmem:[#allocation2 + $0x3] sm:$0x1] %v343_v37  ;;  %v401_v46 = vadd.f32 %v400_v38, %v393_v35  ;;  %v423_v9 = vadd.f32 %v422_v5, %v421_v30  ;;  %v456_v48 = vadd.f32 %v455_v41, %v454_v31  ;;  %v474_v49 = vsel %vm439_vm6, %v1173_v39, 0.0 }
  0x96   : > { %334 = vst [vmem:[#allocation2] sm:$0x1] %v333_v6  ;;  %367 = vst [vmem:[#allocation2 + $0x9] sm:$0x1] %v366_v42  ;;  %v448_v50 = vadd.f32 %v447_v45, %v446_v36  ;;  %v475_v51 = vsel %vm325_vm0, %v474_v49, 0.0  ;;  %v312_v52 = vadd.f32 %v1175_v40, %v1140_v19 }
  0x97   : > { %392 = vst [vmem:[#allocation2 + $0x1] sm:$0x1] %v391_v43  ;;  %402 = vst [vmem:[#allocation2 + $0x4] sm:$0x1] %v401_v46  ;;  %v424_v53 = vadd.f32 %v423_v9, %v415_v44  ;;  %v457_v54 = vrot.slane %v456_v48, 1  ;;  %v476_v55 = vrot.slane %v475_v51, 4 }
  0x98   : > { %v449_v56 = vadd.f32 %v448_v50, %v440_v47  ;;  %v497_v58 = vsub.f32 %v312_v52, %v1180_v4 }
  0x99   : > { %425 = vst [vmem:[#allocation2 + $0xa] sm:$0x1] %v424_v53  ;;  %v458_v12 = vadd.f32 %v457_v54, %v456_v48  ;;  %v477_v39 = vadd.f32 %v476_v55, %v475_v51 }
  0x9a   : > { %450 = vst [vmem:[#allocation2 + $0x2] sm:$0x1] %v449_v56  ;;  %v498_v59 = vsel %vm325_vm0, %v497_v58, 0.0 }
  0x9b   : > { %v459_v60 = vadd.f32 %v458_v12, %v451_v57  ;;  %v478_v61 = vrot.slane %v477_v39, 2  ;;  %v499_v62 = vrot.slane %v498_v59, 4 }
  0x9d   : > { %460 = vst [vmem:[#allocation2 + $0x5] sm:$0x1] %v459_v60  ;;  %v479_v19 = vadd.f32 %v478_v61, %v477_v39  ;;  %v500_v40 = vadd.f32 %v499_v62, %v498_v59 }
  0x9f   : > { %v480_v63 = vrot.slane %v479_v19, 1  ;;  %v501_v1 = vrot.slane %v500_v40, 2 }
  0xa1   : > { %v481_v2 = vadd.f32 %v480_v63, %v479_v19  ;;  %v502_v3 = vadd.f32 %v501_v1, %v500_v40 }
  0xa3   : > { %v482_v4 = vadd.f32 %v481_v2, %v473_v0  ;;  %v503_v7 = vrot.slane %v502_v3, 1 }
  0xa4   : > { %v510_v10 = vld [vmem:[#allocation2] sm:$0xff] }
  0xa5   : > { %483 = vst [vmem:[#allocation2 + $0xb] sm:$0x1] %v482_v4  ;;  %v504_v11 = vadd.f32 %v503_v7, %v502_v3  ;;  %512 = vst [vmem:[%s264_s28] sm:$0xff] %v510_v10 }
  0xa7   : > { %v505_v13 = vadd.f32 %v504_v11, %v496_v8 }
  0xa9   : > { %506 = vst [vmem:[#allocation2 + $0xf] sm:$0x1] %v505_v13 }
  0xb0   : > { %v511_v14 = vld [vmem:[#allocation2 + $0x8] sm:$0xff] }
  0xb1   : > { %513 = vst [vmem:[%s264_s28 + $0x8] sm:$0xff] %v511_v14 }
  0xb2   : > { %837 = shalt.err (!%p834_p1)
}
  0xb3   : > { %s838_s4 = scalar_lea.hbm %s1217_s10, 256  ;;  %s842_s11 = scalar_lea.hbm %s1269_s3, 512 }
  0xb4   : > { %p839_p6 = scmp.ne.s32.totalorder %s1217_s10, %s838_s4  ;;  %p843_p13 = scmp.lt.u32.totalorder %s1217_s10, %s1269_s3 }
  0xb5   : > { %p844_p3 = scmp.lt.u32.totalorder %s842_s11, %s838_s4  ;;  %p846_p0 = scmp.lt.u32.totalorder %s838_s4, %s1217_s10 }
  0xb6   : > { %p840_p2 = pnand %p839_p6, %p1281_p11 }
  0xb7   : > { %p845_p8 = por %p844_p3, %p843_p13 }
  0xb8   : > { %p841_p5 = pneg %p840_p2 }
  0xb9   : > { %p847_p4 = por %p846_p0, %p845_p8 }
  0xbb   : > { %p848_p7 = pnand %p847_p4, %p841_p5 }
  0xbd   : > { %851 = shalt.err (!%p848_p7)
}
  0xbe   : > { %s918_s28 = smov 128   ;;  %s919_s22 = smov 8  }
  0xbf   : > { %684 = dma.vmem_to_hbm [thread:$0]  (%p1281_p11), %s1212_s18, 256, %s1217_s10, %s515_s5, %s918_s28, %s918_s28, %s919_s22  }
  0xc0 PF: > { %s543_s23 = sand.u32 1, %s890_s12   ;;  %p1282_p10 = scmp.ne.s32.totalorder %s1275_s27, 0 }
  0xc1   : > { %p1283_p12 = scmp.ge.s32.totalorder %s910_s17, 2  ;;  %s544_s8 = scalar_lea.sflag [#allocation5], %s543_s23 }
  0xc3   : > { %p694_p9 = pnand %p1283_p12, %p1282_p10 }
  0xc5   : > { %885 = dma.done.wait (!%p694_p9), %s544_s8, 256  }
  0xc6   : > { %887 = vsyncadd (!%p694_p9), %s544_s8, 4294967040  ;;  %s22_s17 = sadd.s32 1, %s910_s17   ;;  %s1284_s12 = smov %s894_s13 }
  0xc7   : > { %p19_p1 = scmp.ge.s32.totalorder %s22_s17, 4   ;;  %s1285_s13 = smov %s898_s14 }
  0xc8   : > { %s1286_s14 = smov %s996_s26  ;;  %s1287_s15 = smov %s906_s16 }
  0xc9   : > { %s1288_s16 = smov %s1290_s20  ;;  %21 = sbr.rel (!%p19_p1) target bundleno = 8 (0x8), region = 104 }
  0xd0   :  { %549 = vsyncpa [#allocation4], 1 }
  0xd1   :  { %551 = vsyncpa [#allocation4 + $0x1], 1 }
  0xd2   :  { %552 = vsyncpa [#allocation7], 1 }
  0xd3   :  { %554 = vsyncpa [#allocation7 + $0x1], 1 }
  0xd4   :  { %555 = vsyncpa [#allocation5], 1 }
  0xd5   :  { %557 = vsyncpa [#allocation5 + $0x1], 1 }

</bundles_post_ra>
